<compile_context>
chip_gen: v7x
topology: tpu7x:2x2x1
jax: 0.10.0
libtpu: 0.0.40
codegen_flags: <defaults>
</compile_context>

<pallas_src>
import jax
import jax.numpy as jnp
import numpy as np
from jax import lax
from jax.experimental import pallas as pl
from jax.experimental.pallas import tpu as pltpu

EPS = 1e-5


def _make_resblock_kernel(L, K, NL, NLp):
    pad = (K - 1) // 2

    def kernel(x_ref, gb_ref, w1_ref, w2_ref, o_ref):
        x = x_ref[...].astype(jnp.float32)              # (Cp, NLp) lane-dense
        inv_cnt = 1.0 / float(NL)

        # ---- hoisted once; reused by both BNs and both convs --------------
        lane_idx = lax.broadcasted_iota(jnp.int32, (1, NLp), 1)   # (1, NLp)
        lane_in_seg = lane_idx % L
        pad_lane = (lane_idx < NL).astype(jnp.float32)            # 1 real / 0 pad
        shifts = sorted({(pad - k) % L for k in range(K)} - {0})
        wrap_ge = {s: lane_in_seg >= s for s in shifts}           # (1, NLp) bools

        def bn_relu(h, col):
            # Two-pass (centered) stats over the real N*L lanes only, folded
            # into a per-channel affine; full-tensor work is one mul+add+relu.
            mean = jnp.sum(h * pad_lane, axis=1, keepdims=True) * inv_cnt
            d = (h - mean) * pad_lane
            var = jnp.sum(d * d, axis=1, keepdims=True) * inv_cnt
            gamma = gb_ref[:, 2 * col:2 * col + 1]                # (Cp, 1)
            beta = gb_ref[:, 2 * col + 1:2 * col + 2]             # (Cp, 1)
            scale = gamma * lax.rsqrt(var + EPS)                  # EUP rsqrt
            shift = beta - mean * scale
            return jnp.maximum(h * scale + shift, 0.0)

        def roll_segments(h, s):
            # Circular roll by `s` inside every length-L segment of the
            # flattened lane axis: two whole-array lane rolls + one lane
            # select with a hoisted (1, NLp) mask.  Pad lanes never source
            # into real lanes (sources stay inside the originating segment).
            if s == 0:
                return h
            r_in = pltpu.roll(h, shift=s, axis=1)
            r_wrap = pltpu.roll(h, shift=(s - L) % NLp, axis=1)
            return jnp.where(wrap_ge[s], r_in, r_wrap)

        def circular_conv(h, w_ref):
            # Fold the K taps into ONE MXU dot: stack the rolled copies along
            # sublanes -> (K*Cp, NLp), contract against bf16 (Cp, K*Cp)
            # weights with f32 accumulation.
            taps = [roll_segments(h, (pad - k) % L) for k in range(K)]
            stacked = jnp.concatenate(taps, axis=0).astype(jnp.bfloat16)
            return jnp.dot(w_ref[...], stacked,
                           preferred_element_type=jnp.float32)    # (Cp, NLp) f32

        h = bn_relu(x, 0)
        h = circular_conv(h, w1_ref)
        h = bn_relu(h, 1)
        h = circular_conv(h, w2_ref)
        o_ref[...] = (h + x).astype(o_ref.dtype)                  # residual

    return kernel


def resblock(x, g1, b1, w1, g2, b2, w2):
    """x: (N, C, L); g*/b*: (C,); w*: (C, C, K), odd K. Returns (N, C, L)."""
    N, C, L = x.shape
    C_out, C_in, K = w1.shape
    assert C_out == C and C_in == C, "residual add needs in_channels == out_channels"
    assert K % 2 == 1, "circular pad (K-1)//2 only yields length-L output for odd K"
    NL = N * L
    Cp = ((C + 7) // 8) * 8            # sublane-aligned channel count
    NLp = ((NL + 127) // 128) * 128    # lane-dense multiple of 128
    # TODO(synk): for large C, pad channels to the MXU width (128 on v5e,
    # 256 on v6e/v7x) instead of just the sublane multiple of 8.

    # Wrapper-side layout plumbing (pure XLA), all zero-padded.
    x2d = jnp.transpose(x, (1, 0, 2)).reshape(C, NL)
    x2d = jnp.pad(x2d, ((0, Cp - C), (0, NLp - NL)))                  # (Cp, NLp)

    def pack_gb(g, b):   # padded gamma/beta are 0 -> padded channels stay 0
        return jnp.stack([jnp.pad(g.astype(jnp.float32), (0, Cp - C)),
                          jnp.pad(b.astype(jnp.float32), (0, Cp - C))], axis=1)
    gb = jnp.concatenate([pack_gb(g1, b1), pack_gb(g2, b2)], axis=1)  # (Cp, 4)

    def flat_w(w):       # (C_out, C_in, K) -> (Cp, K*Cp) bf16, tap-major cols
        wt = jnp.pad(jnp.transpose(w, (0, 2, 1)),                     # (C_out, K, C_in)
                     ((0, Cp - C), (0, 0), (0, Cp - C)))
        return wt.reshape(Cp, K * Cp).astype(jnp.bfloat16)
    w1f, w2f = flat_w(w1), flat_w(w2)

    vmem = pl.BlockSpec(memory_space=pltpu.MemorySpace.VMEM)
    out2d = pl.pallas_call(
        _make_resblock_kernel(L, K, NL, NLp),
        out_shape=jax.ShapeDtypeStruct((Cp, NLp), x.dtype),
        in_specs=[vmem] * 4,
        out_specs=vmem,
    )(x2d, gb, w1f, w2f)
    # TODO(synk): for non-toy shapes, grid over the N*L lane axis (two-pass BN
    # stats in VMEM scratch across an "arbitrary" axis + pad-column halo for
    # the circular boundary) so BlockSpec double-buffering and both v7x
    # TensorCores ("parallel" axis, explicit vmem_limit_bytes) are used.
    out2d = out2d[:C, :NL]
    return jnp.transpose(out2d.reshape(C, N, L), (1, 0, 2))


def resblock_ref(x, g1, b1, w1, g2, b2, w2):
    """Pure-JAX reference mirroring torch training-mode forward."""
    def bn_relu(h, g, b):
        mean = h.mean(axis=(0, 2), keepdims=True)
        var = ((h - mean) ** 2).mean(axis=(0, 2), keepdims=True)
        hn = (h - mean) / jnp.sqrt(var + EPS) * g[None, :, None] + b[None, :, None]
        return jnp.maximum(hn, 0.0)

    def conv(h, w):
        K = w.shape[2]
        pad = (K - 1) // 2
        hp = jnp.concatenate([h[..., -pad:], h, h[..., :pad]], axis=-1)  # circular pad
        return jax.lax.conv_general_dilated(
            hp, w, window_strides=(1,), padding="VALID",
            dimension_numbers=("NCH", "OIH", "NCH"))

    h = bn_relu(x, g1, b1)
    h = conv(h, w1)
    h = bn_relu(h, g2, b2)
    h = conv(h, w2)
    return h + x


if __name__ == "__main__":
    N, C, L, K = 2, 4, 16, 3   # batch, channels (in == out), length, kernel_size

    key = jax.random.PRNGKey(0)
    kx, k1, k2, k3, k4, k5, k6 = jax.random.split(key, 7)
    x  = jax.random.normal(kx, (N, C, L), jnp.float32)
    g1 = 1.0 + 0.1 * jax.random.normal(k1, (C,), jnp.float32)
    b1 = 0.1 * jax.random.normal(k2, (C,), jnp.float32)
    w1 = 0.2 * jax.random.normal(k3, (C, C, K), jnp.float32)
    g2 = 1.0 + 0.1 * jax.random.normal(k4, (C,), jnp.float32)
    b2 = 0.1 * jax.random.normal(k5, (C,), jnp.float32)
    w2 = 0.2 * jax.random.normal(k6, (C, C, K), jnp.float32)

    out = jax.block_until_ready(resblock(x, g1, b1, w1, g2, b2, w2))
    ref = resblock_ref(x, g1, b1, w1, g2, b2, w2)

    assert out.shape == (N, C, L)
    # Tolerance reflects bf16 MXU operands (f32 accumulation, f32 reference).
    np.testing.assert_allclose(np.asarray(out), np.asarray(ref), rtol=3e-2, atol=3e-2)
    print("KERNEL_OK")
</pallas_src>

<mosaic_0001>
module attributes {stable_mosaic.version = 11 : i64} {
  func.func @kernel(%arg0: memref<8x128xf32, #tpu.memory_space<vmem>>, %arg1: memref<8x4xf32, #tpu.memory_space<vmem>>, %arg2: memref<8x24xbf16, #tpu.memory_space<vmem>>, %arg3: memref<8x24xbf16, #tpu.memory_space<vmem>>, %arg4: memref<8x128xf32, #tpu.memory_space<vmem>>) attributes {dimension_semantics = [], scalar_prefetch = 0 : i64, scratch_operands = 0 : i64, tpu.core_type = #tpu.core_type<tc>} {
    %c0 = arith.constant 0 : index
    %c0_0 = arith.constant 0 : index
    %0 = vector.load %arg0[%c0, %c0_0] : memref<8x128xf32, #tpu.memory_space<vmem>>, vector<8x128xf32>
    %1 = tpu.iota {dimensions = array<i32: 1>} : vector<1x128xi32>
    %c16_i32 = arith.constant 16 : i32
    %c0_i32 = arith.constant 0 : i32
    %2 = arith.cmpi eq, %c16_i32, %c0_i32 : i32
    %c1_i32 = arith.constant 1 : i32
    %3 = arith.select %2, %c1_i32, %c16_i32 : i32
    %4 = vector.broadcast %3 : i32 to vector<1x128xi32>
    %5 = arith.remsi %1, %4 : vector<1x128xi32>
    %c0_i32_1 = arith.constant 0 : i32
    %6 = vector.broadcast %c0_i32_1 : i32 to vector<1x128xi32>
    %7 = arith.cmpi ne, %5, %6 : vector<1x128xi32>
    %c0_i32_2 = arith.constant 0 : i32
    %8 = vector.broadcast %c0_i32_2 : i32 to vector<1x128xi32>
    %9 = arith.cmpi slt, %5, %8 : vector<1x128xi32>
    %c0_i32_3 = arith.constant 0 : i32
    %10 = arith.cmpi slt, %3, %c0_i32_3 : i32
    %11 = vector.broadcast %10 : i1 to vector<1x128xi1>
    %12 = vector.broadcast %11 : vector<1x128xi1> to vector<1x128xi1>
    %13 = arith.xori %9, %12 : vector<1x128xi1>
    %14 = arith.andi %13, %7 : vector<1x128xi1>
    %15 = vector.broadcast %3 : i32 to vector<1x128xi32>
    %16 = arith.addi %5, %15 : vector<1x128xi32>
    %17 = arith.select %14, %16, %5 : vector<1x128xi1>, vector<1x128xi32>
    %c32_i32 = arith.constant 32 : i32
    %18 = vector.broadcast %c32_i32 : i32 to vector<1x128xi32>
    %19 = arith.cmpi slt, %1, %18 : vector<1x128xi32>
    %20 = arith.extui %19 : vector<1x128xi1> to vector<1x128xi32>
    %21 = arith.sitofp %20 : vector<1x128xi32> to vector<1x128xf32>
    %c1_i32_4 = arith.constant 1 : i32
    %22 = vector.broadcast %c1_i32_4 : i32 to vector<1x128xi32>
    %23 = arith.cmpi sge, %17, %22 : vector<1x128xi32>
    %c15_i32 = arith.constant 15 : i32
    %24 = vector.broadcast %c15_i32 : i32 to vector<1x128xi32>
    %25 = arith.cmpi sge, %17, %24 : vector<1x128xi32>
    %26 = vector.broadcast %21 : vector<1x128xf32> to vector<8x128xf32>
    %27 = arith.mulf %0, %26 : vector<8x128xf32>
    %cst = arith.constant dense<0.000000e+00> : vector<8xf32>
    %28 = vector.multi_reduction <add>, %27, %cst [1] : vector<8x128xf32> to vector<8xf32>
    %29 = vector.shape_cast %28 : vector<8xf32> to vector<8x1xf32>
    %cst_5 = arith.constant 3.125000e-02 : f32
    %30 = vector.broadcast %cst_5 : f32 to vector<8x1xf32>
    %31 = arith.mulf %29, %30 : vector<8x1xf32>
    %32 = vector.broadcast %31 : vector<8x1xf32> to vector<8x128xf32>
    %33 = arith.subf %0, %32 : vector<8x128xf32>
    %34 = vector.broadcast %21 : vector<1x128xf32> to vector<8x128xf32>
    %35 = arith.mulf %33, %34 : vector<8x128xf32>
    %36 = arith.mulf %35, %35 : vector<8x128xf32>
    %cst_6 = arith.constant dense<0.000000e+00> : vector<8xf32>
    %37 = vector.multi_reduction <add>, %36, %cst_6 [1] : vector<8x128xf32> to vector<8xf32>
    %38 = vector.shape_cast %37 : vector<8xf32> to vector<8x1xf32>
    %cst_7 = arith.constant 3.125000e-02 : f32
    %39 = vector.broadcast %cst_7 : f32 to vector<8x1xf32>
    %40 = arith.mulf %38, %39 : vector<8x1xf32>
    %c0_8 = arith.constant 0 : index
    %c0_9 = arith.constant 0 : index
    %41 = vector.load %arg1[%c0_8, %c0_9] : memref<8x4xf32, #tpu.memory_space<vmem>>, vector<8x1xf32>
    %c0_10 = arith.constant 0 : index
    %c1 = arith.constant 1 : index
    %42 = vector.load %arg1[%c0_10, %c1] : memref<8x4xf32, #tpu.memory_space<vmem>>, vector<8x1xf32>
    %cst_11 = arith.constant 9.99999974E-6 : f32
    %43 = vector.broadcast %cst_11 : f32 to vector<8x1xf32>
    %44 = arith.addf %40, %43 : vector<8x1xf32>
    %45 = math.rsqrt %44 : vector<8x1xf32>
    %46 = arith.mulf %41, %45 : vector<8x1xf32>
    %47 = arith.mulf %31, %46 : vector<8x1xf32>
    %48 = arith.subf %42, %47 : vector<8x1xf32>
    %49 = vector.broadcast %46 : vector<8x1xf32> to vector<8x128xf32>
    %50 = arith.mulf %0, %49 : vector<8x128xf32>
    %51 = vector.broadcast %48 : vector<8x1xf32> to vector<8x128xf32>
    %52 = arith.addf %50, %51 : vector<8x128xf32>
    %cst_12 = arith.constant 0.000000e+00 : f32
    %53 = vector.broadcast %cst_12 : f32 to vector<8x128xf32>
    %54 = arith.maximumf %52, %53 : vector<8x128xf32>
    %c1_i32_13 = arith.constant 1 : i32
    %55 = tpu.dynamic_rotate %54 by %c1_i32_13 dim 1 : vector<8x128xf32>, i32 -> vector<8x128xf32>
    %c113_i32 = arith.constant 113 : i32
    %56 = tpu.dynamic_rotate %54 by %c113_i32 dim 1 : vector<8x128xf32>, i32 -> vector<8x128xf32>
    %57 = vector.shape_cast %23 : vector<1x128xi1> to vector<1x128xi1>
    %58 = vector.broadcast %57 : vector<1x128xi1> to vector<8x128xi1>
    %59 = arith.select %58, %55, %56 : vector<8x128xi1>, vector<8x128xf32>
    %c15_i32_14 = arith.constant 15 : i32
    %60 = tpu.dynamic_rotate %54 by %c15_i32_14 dim 1 : vector<8x128xf32>, i32 -> vector<8x128xf32>
    %c127_i32 = arith.constant 127 : i32
    %61 = tpu.dynamic_rotate %54 by %c127_i32 dim 1 : vector<8x128xf32>, i32 -> vector<8x128xf32>
    %62 = vector.shape_cast %25 : vector<1x128xi1> to vector<1x128xi1>
    %63 = vector.broadcast %62 : vector<1x128xi1> to vector<8x128xi1>
    %64 = arith.select %63, %60, %61 : vector<8x128xi1>, vector<8x128xf32>
    %65 = tpu.concatenate %59, %54, %64 in 0 : vector<8x128xf32>, vector<8x128xf32>, vector<8x128xf32> -> vector<24x128xf32>
    %66 = arith.truncf %65 : vector<24x128xf32> to vector<24x128xbf16>
    %c0_15 = arith.constant 0 : index
    %c0_16 = arith.constant 0 : index
    %67 = vector.load %arg2[%c0_15, %c0_16] : memref<8x24xbf16, #tpu.memory_space<vmem>>, vector<8x24xbf16>
    %cst_17 = arith.constant dense<0.000000e+00> : vector<8x128xf32>
    %68 = tpu.matmul %67, %66, %cst_17 {dimension_numbers = #tpu.dot_dimension_numbers<[1], [0], [0], [1], [0, 0, 1, 1], [], []>} : vector<8x24xbf16>, vector<24x128xbf16>, vector<8x128xf32> -> vector<8x128xf32>
    %69 = vector.broadcast %21 : vector<1x128xf32> to vector<8x128xf32>
    %70 = arith.mulf %68, %69 : vector<8x128xf32>
    %cst_18 = arith.constant dense<0.000000e+00> : vector<8xf32>
    %71 = vector.multi_reduction <add>, %70, %cst_18 [1] : vector<8x128xf32> to vector<8xf32>
    %72 = vector.shape_cast %71 : vector<8xf32> to vector<8x1xf32>
    %cst_19 = arith.constant 3.125000e-02 : f32
    %73 = vector.broadcast %cst_19 : f32 to vector<8x1xf32>
    %74 = arith.mulf %72, %73 : vector<8x1xf32>
    %75 = vector.broadcast %74 : vector<8x1xf32> to vector<8x128xf32>
    %76 = arith.subf %68, %75 : vector<8x128xf32>
    %77 = vector.broadcast %21 : vector<1x128xf32> to vector<8x128xf32>
    %78 = arith.mulf %76, %77 : vector<8x128xf32>
    %79 = arith.mulf %78, %78 : vector<8x128xf32>
    %cst_20 = arith.constant dense<0.000000e+00> : vector<8xf32>
    %80 = vector.multi_reduction <add>, %79, %cst_20 [1] : vector<8x128xf32> to vector<8xf32>
    %81 = vector.shape_cast %80 : vector<8xf32> to vector<8x1xf32>
    %cst_21 = arith.constant 3.125000e-02 : f32
    %82 = vector.broadcast %cst_21 : f32 to vector<8x1xf32>
    %83 = arith.mulf %81, %82 : vector<8x1xf32>
    %c0_22 = arith.constant 0 : index
    %c2 = arith.constant 2 : index
    %84 = vector.load %arg1[%c0_22, %c2] : memref<8x4xf32, #tpu.memory_space<vmem>>, vector<8x1xf32>
    %c0_23 = arith.constant 0 : index
    %c3 = arith.constant 3 : index
    %85 = vector.load %arg1[%c0_23, %c3] : memref<8x4xf32, #tpu.memory_space<vmem>>, vector<8x1xf32>
    %cst_24 = arith.constant 9.99999974E-6 : f32
    %86 = vector.broadcast %cst_24 : f32 to vector<8x1xf32>
    %87 = arith.addf %83, %86 : vector<8x1xf32>
    %88 = math.rsqrt %87 : vector<8x1xf32>
    %89 = arith.mulf %84, %88 : vector<8x1xf32>
    %90 = arith.mulf %74, %89 : vector<8x1xf32>
    %91 = arith.subf %85, %90 : vector<8x1xf32>
    %92 = vector.broadcast %89 : vector<8x1xf32> to vector<8x128xf32>
    %93 = arith.mulf %68, %92 : vector<8x128xf32>
    %94 = vector.broadcast %91 : vector<8x1xf32> to vector<8x128xf32>
    %95 = arith.addf %93, %94 : vector<8x128xf32>
    %cst_25 = arith.constant 0.000000e+00 : f32
    %96 = vector.broadcast %cst_25 : f32 to vector<8x128xf32>
    %97 = arith.maximumf %95, %96 : vector<8x128xf32>
    %c1_i32_26 = arith.constant 1 : i32
    %98 = tpu.dynamic_rotate %97 by %c1_i32_26 dim 1 : vector<8x128xf32>, i32 -> vector<8x128xf32>
    %c113_i32_27 = arith.constant 113 : i32
    %99 = tpu.dynamic_rotate %97 by %c113_i32_27 dim 1 : vector<8x128xf32>, i32 -> vector<8x128xf32>
    %100 = vector.shape_cast %23 : vector<1x128xi1> to vector<1x128xi1>
    %101 = vector.broadcast %100 : vector<1x128xi1> to vector<8x128xi1>
    %102 = arith.select %101, %98, %99 : vector<8x128xi1>, vector<8x128xf32>
    %c15_i32_28 = arith.constant 15 : i32
    %103 = tpu.dynamic_rotate %97 by %c15_i32_28 dim 1 : vector<8x128xf32>, i32 -> vector<8x128xf32>
    %c127_i32_29 = arith.constant 127 : i32
    %104 = tpu.dynamic_rotate %97 by %c127_i32_29 dim 1 : vector<8x128xf32>, i32 -> vector<8x128xf32>
    %105 = vector.shape_cast %25 : vector<1x128xi1> to vector<1x128xi1>
    %106 = vector.broadcast %105 : vector<1x128xi1> to vector<8x128xi1>
    %107 = arith.select %106, %103, %104 : vector<8x128xi1>, vector<8x128xf32>
    %108 = tpu.concatenate %102, %97, %107 in 0 : vector<8x128xf32>, vector<8x128xf32>, vector<8x128xf32> -> vector<24x128xf32>
    %109 = arith.truncf %108 : vector<24x128xf32> to vector<24x128xbf16>
    %c0_30 = arith.constant 0 : index
    %c0_31 = arith.constant 0 : index
    %110 = vector.load %arg3[%c0_30, %c0_31] : memref<8x24xbf16, #tpu.memory_space<vmem>>, vector<8x24xbf16>
    %cst_32 = arith.constant dense<0.000000e+00> : vector<8x128xf32>
    %111 = tpu.matmul %110, %109, %cst_32 {dimension_numbers = #tpu.dot_dimension_numbers<[1], [0], [0], [1], [0, 0, 1, 1], [], []>} : vector<8x24xbf16>, vector<24x128xbf16>, vector<8x128xf32> -> vector<8x128xf32>
    %112 = arith.addf %111, %0 : vector<8x128xf32>
    %c0_33 = arith.constant 0 : index
    %c0_34 = arith.constant 0 : index
    %113 = vector.load %arg4[%c0_33, %c0_34] : memref<8x128xf32, #tpu.memory_space<vmem>>, vector<8x128xf32>
    tpu.vector_store %arg4[%c0_33, %c0_34], %112 {strides = array<i32>} : memref<8x128xf32, #tpu.memory_space<vmem>>, vector<8x128xf32>,
    return
  }
}

</mosaic_0001>

<bundles_post_ra>
// kernel: tpu_custom_call.1
= control target key start
LH: loop header
LB: loop body
LE: loop exit
PB: predicated region body
PF: predicated region fallthrough
CT: control target
= control target key end

     0   :  { %v20_v0 = vlaneseq  ;;  %s427_s0 = inlined_call_operand.vmem [shape: f32[8,128], index: 0, kind: input, shape index: {}]   ;;  %s428_s1 = inlined_call_operand.vmem [shape: f32[8,4], index: 1, kind: input, shape index: {}]   ;;  %s429_s2 = inlined_call_operand.vmem [shape: bf16[8,24], index: 2, kind: input, shape index: {}]   ;;  %s430_s3 = inlined_call_operand.vmem [shape: bf16[8,24], index: 3, kind: input, shape index: {}]   ;;  %s431_s4 = inlined_call_operand.hbm [shape: f32[8,128], index: 4, kind: output, shape index: {}]  }
   0x1   :  { %9 = vsyncpa [#allocation3], 0  ;;  %v312_v1 = vmov 0.0   ;;  %v353_v3 = vld [vmem:[%s427_s0] sm:$0xff]  ;;  %v313_v11 = vmov 0   ;;  %v314_v15 = vmov 1  }
   0x2   :  { %252 = vmatprep.subr.bf16.mxu0 %v312_v1  ;;  %260 = vmatprep.subr.bf16.mxu1 %v312_v1  ;;  %v21_v2 = vand.u32 127, %v20_v0  ;;  %v365_v16 = vld [vmem:[%s428_s1] sm:$0xff]  ;;  %s315_s18 = smov 1   ;;  %s316_s1 = smov 113   ;;  %vm317_vm1 = vmmov 0   ;;  %vm93_vm4 = vcmask 1043456  }
   0x3   :  { %279 = vset.pattern.permute.xlu1 %v313_v11  ;;  %280 = vset.pattern.permute.xlu0 %v314_v15  ;;  %s318_s19 = smov 15   ;;  %s319_s20 = smov 127   ;;  %v88_v39 = vld [vmem:[%s429_s2] sm:$0xf]  ;;  %vm89_vm5 = vcmask 195584   ;;  %v320_v50 = vmov 2  }
   0x4   :  { %vm34_vm0 = vcmp.lt.s32.totalorder %v21_v2, 32  ;;  %256 = vmatprep.mubr.msk.bf16.mxu0 %vm317_vm1, %v312_v1  ;;  %264 = vmatprep.mubr.msk.bf16.mxu1 %vm317_vm1, %v312_v1  ;;  %v26_v27 = vand.u32 15, %v21_v2  ;;  %v321_v54 = vmov 3   ;;  %s322_s24 = smov [#allocation2]  }
   0x5   :  { %v356_v4 = vsel %vm34_vm0, 1.0, %v312_v1  ;;  %s235_s25 = sshll.u32 %s322_s24, 4  ;;  %s236_s25 = int_to_ptr.vmem [resolvable:$true] %s235_s25 }
   0x6   :  { %v39_v5 = vmul.f32 %v356_v4, %v353_v3  ;;  %vm377_vm2 = vcmp.ge.s32.totalorder %v26_v27, 1  ;;  %vm384_vm3 = vcmp.ge.s32.totalorder %v26_v27, 15  ;;  %s288_s26 = scalar_lea.vmem %s236_s25, 128  ;;  %p293_p1 = scmp.lt.s32.totalorder %s236_s25, %s236_s25 }
   0x7   :  { %p289_p0 = scmp.ne.s32.totalorder %s236_s25, %s288_s26  ;;  %p294_p2 = scmp.lt.s32.totalorder %s288_s26, %s288_s26 }
   0x8   :  { %40 = vadd.xlane.f32.xlu0 %v39_v5 }
   0x9   :  { %p295_p3 = por %p294_p2, %p293_p1 }
   0xb   :  { %p296_p4 = pnand %p295_p3, %p289_p0 }
  0x95   :  { %v41_v6 = vpop.xlane.xlu0 %40 }
  0x96   :  { %v42_v7 = vmul.f32 0.03125, %v41_v6 }
  0x98   :  { %v43_v8 = vsub.f32 %v353_v3, %v42_v7 }
  0x9a   :  { %v44_v9 = vmul.f32 %v356_v4, %v43_v8 }
  0x9c   :  { %v45_v10 = vmul.f32 %v44_v9, %v44_v9 }
  0x9e   :  { %46 = vadd.xlane.f32.xlu0 %v45_v10 }
 0x12b   :  { %v47_v12 = vpop.xlane.xlu0 %46 }
 0x12c   :  { %v48_v13 = vmul.f32 0.03125, %v47_v12  ;;  %v181_v12 = vld [vmem:[%s430_s3] sm:$0xf] }
 0x12e   :  { %v50_v14 = vadd.f32 1e-05, %v48_v13 }
 0x130   :  { %284 = vrsqrt.f32 %v50_v14 }
 0x13a   :  { %v285_v17 = vpop.eup %284 }
 0x13b   :  { %v52_v18 = vmul.f32 %v285_v17, %v365_v16 }
 0x13d   :  { %v53_v19 = vmul.f32 %v52_v18, %v42_v7 }
 0x13f   :  { %55 = vrot.lane.b32.xlu1 %v53_v19, %s315_s18 }
 0x143   :  { %61 = vperm.xlu1 %279, %v52_v18  }
 0x147   :  { %281 = vset.pattern.permute.xlu1 %v320_v50 }
 0x1b1   :  { %v56_v20 = vpop.permute.xlu1 %55 }
 0x1b2   :  { %v58_v21 = vsub.f32 %v365_v16, %v56_v20 }
 0x1b4   :  { %67 = vperm.xlu0 %280, %v58_v21  }
 0x1b8   :  { %283 = vset.pattern.permute.xlu0 %v321_v54 }
 0x1c2   :  { %v62_v22 = vpop.permute.xlu1 %61 }
 0x1c3   :  { %v64_v23 = vmul.f32 %v62_v22, %v353_v3 }
 0x233   :  { %v68_v24 = vpop.permute.xlu0 %67 }
 0x234   :  { %v70_v25 = vadd.f32 %v68_v24, %v64_v23 }
 0x236   :  { %v71_v26 = vmax.f32 %v70_v25, 0.0 }
 0x238   :  { %72 = vrot.lane.b32.xlu1 %v71_v26, %s315_s18 }
 0x23c   :  { %74 = vrot.lane.b32.xlu1 %v71_v26, %s316_s1 }
 0x240   :  { %79 = vrot.lane.b32.xlu1 %v71_v26, %s318_s19 }
 0x244   :  { %81 = vrot.lane.b32.xlu1 %v71_v26, %s319_s20 }
 0x2aa   :  { %v73_v28 = vpop.permute.xlu1 %72 }
 0x2ae   :  { %v75_v30 = vpop.permute.xlu1 %74 }
 0x2af   :  { %v78_v31 = vsel %vm377_vm2, %v73_v28, %v75_v30 }
 0x2b0   :  { %v86_v32 = vpack.c.bf16 %v71_v26, %v78_v31 }
 0x2b2   :  { %253 = vmatpush3.bf16.msra.mxu0 %v86_v32  ;;  %v80_v33 = vpop.permute.xlu1 %79 }
 0x2b3   :  { %254 = vmatprep.subr.bf16.mxu0 %v312_v1 }
 0x2b6   :  { %v82_v35 = vpop.permute.xlu1 %81 }
 0x2b7   :  { %v85_v36 = vsel %vm384_vm3, %v80_v33, %v82_v35 }
 0x2b8   :  { %v87_v37 = vpack.c.bf16 %v85_v36, %v85_v36 }
 0x2ba   :  { %v95_v38 = vsel %vm93_vm4, %v87_v37, 0 }
 0x2bb   :  { %255 = vmatpush3.bf16.msra.mxu0 %v95_v38 }
 0x2be   :  { %257 = vmatmul.mubr.msk.bf16.vlgmr.msra.gmra.mrb[0].mxu0 %vm89_vm5, %v88_v39 }
 0x391   :  { %v131_v40 = vpop.f32.mrb[0].mxu0 }
 0x392   :  { %v258_v41 = vpop.f32.mrb[1].mxu0  ;;  %v137_v42 = vmul.f32 %v356_v4, %v131_v40 }
 0x393   :  { %v134_v43 = vpop.f32.mrb[2].mxu0 }
 0x394   :  { %138 = vadd.xlane.f32.xlu1 %v137_v42  ;;  %v259_v44 = vpop.f32.mrb[3].mxu0 }
 0x421   :  { %v139_v45 = vpop.xlane.xlu1 %138 }
 0x422   :  { %v140_v46 = vmul.f32 0.03125, %v139_v45 }
 0x424   :  { %v141_v47 = vsub.f32 %v131_v40, %v140_v46 }
 0x426   :  { %v142_v48 = vmul.f32 %v356_v4, %v141_v47 }
 0x428   :  { %v143_v49 = vmul.f32 %v142_v48, %v142_v48 }
 0x42a   :  { %144 = vadd.xlane.f32.xlu0 %v143_v49 }
 0x4b7   :  { %v145_v51 = vpop.xlane.xlu0 %144 }
 0x4b8   :  { %v146_v52 = vmul.f32 0.03125, %v145_v51 }
 0x4ba   :  { %v147_v53 = vadd.f32 1e-05, %v146_v52 }
 0x4bc   :  { %286 = vrsqrt.f32 %v147_v53 }
 0x4c6   :  { %v287_v55 = vpop.eup %286 }
 0x4c7   :  { %v149_v56 = vmul.f32 %v287_v55, %v365_v16 }
 0x4c9   :  { %v150_v57 = vmul.f32 %v149_v56, %v140_v46 }
 0x4cb   :  { %152 = vrot.lane.b32.xlu1 %v150_v57, %s315_s18 }
 0x4cf   :  { %158 = vperm.xlu1 %281, %v149_v56  }
 0x4d3   :  { %282 = vset.pattern.permute.xlu1 %v321_v54 }
 0x53d   :  { %v153_v58 = vpop.permute.xlu1 %152 }
 0x53e   :  { %v155_v59 = vsub.f32 %v365_v16, %v153_v58 }
 0x540   :  { %164 = vperm.xlu1 %282, %v155_v59  }
 0x54e   :  { %v159_v60 = vpop.permute.xlu1 %158 }
 0x54f   :  { %v161_v61 = vmul.f32 %v159_v60, %v131_v40 }
 0x5bf   :  { %v165_v62 = vpop.permute.xlu1 %164 }
 0x5c0   :  { %v167_v63 = vadd.f32 %v165_v62, %v161_v61 }
 0x5c2   :  { %v168_v0 = vmax.f32 %v167_v63, 0.0 }
 0x5c4   :  { %171 = vrot.lane.b32.xlu1 %v168_v0, %s316_s1  ;;  %169 = vrot.lane.b32.xlu0 %v168_v0, %s315_s18 }
 0x5c8   :  { %174 = vrot.lane.b32.xlu1 %v168_v0, %s318_s19 }
 0x5cc   :  { %176 = vrot.lane.b32.xlu1 %v168_v0, %s319_s20 }
 0x636   :  { %v172_v2 = vpop.permute.xlu1 %171  ;;  %v170_v4 = vpop.permute.xlu0 %169 }
 0x637   :  { %v173_v5 = vsel %vm377_vm2, %v170_v4, %v172_v2 }
 0x638   :  { %v179_v6 = vpack.c.bf16 %v168_v0, %v173_v5 }
 0x63a   :  { %v175_v7 = vpop.permute.xlu1 %174  ;;  %261 = vmatpush3.bf16.msra.mxu1 %v179_v6 }
 0x63b   :  { %262 = vmatprep.subr.bf16.mxu1 %v312_v1 }
 0x63e   :  { %v177_v8 = vpop.permute.xlu1 %176 }
 0x63f   :  { %v178_v9 = vsel %vm384_vm3, %v175_v7, %v177_v8 }
 0x640   :  { %v180_v10 = vpack.c.bf16 %v178_v9, %v178_v9 }
 0x642   :  { %v186_v11 = vsel %vm93_vm4, %v180_v10, 0 }
 0x643   :  { %263 = vmatpush3.bf16.msra.mxu1 %v186_v11 }
 0x646   :  { %265 = vmatmul.mubr.msk.bf16.vlgmr.msra.gmra.mrb[0].mxu1 %vm89_vm5, %v181_v12 }
 0x719   :  { %v222_v13 = vpop.f32.mrb[0].mxu1 }
 0x71a   :  { %v223_v14 = vadd.f32 %v222_v13, %v353_v3  ;;  %v266_v1 = vpop.f32.mrb[1].mxu1 }
 0x71b   :  { %v225_v15 = vpop.f32.mrb[2].mxu1 }
 0x71c   :  { %228 = vst [vmem:[#allocation2] sm:$0xff] %v223_v14  ;;  %v267_v16 = vpop.f32.mrb[3].mxu1 }
 0x71d   :  { %299 = shalt.err (!%p296_p4)
}
 0x71e   :  { %s300_s28 = scalar_lea.hbm %s431_s4, 128 }
 0x71f   :  { %p301_p5 = scmp.ne.s32.totalorder %s431_s4, %s300_s28  ;;  %p304_p6 = scmp.lt.u32.totalorder %s300_s28, %s431_s4 }
 0x721   :  { %p306_p7 = pnand %p304_p6, %p301_p5 }
 0x723   :  { %309 = shalt.err (!%p306_p7)
}
 0x724   :  { %238 = dma.vmem_to_hbm [thread:$0]  %s236_s25, 128, %s431_s4, [#allocation3]  }
 0x725   :  { %310 = dma.done.wait [#allocation3], 128  }
 0x726   :  { %311 = vsyncadd [#allocation3], 4294967168 }
 0x727   :  { %242 = vsyncpa [#allocation3], 1 }

</bundles_post_ra>
